<compile_context>
chip_gen: v6e
topology: v6e:2x2x1
jax: 0.10.0
libtpu: 0.0.40
codegen_flags: <defaults>
</compile_context>

<pallas_src>
import math
import numpy as np
import jax
import jax.numpy as jnp
from jax.experimental import pallas as pl
from jax.experimental.pallas import tpu as pltpu


def _round_up(a: int, m: int) -> int:
    return (a + m - 1) // m * m


def bilinear_weight_matrix(in_size: int, out_size: int) -> np.ndarray:
    """Row-stochastic [out_size, in_size] matrix matching F.interpolate(mode='bilinear',
    align_corners=False) along one axis.  Kept in float64 so host-side composition of the
    two resize stages is exact before the final cast to float32."""
    scale = in_size / out_size
    o = np.arange(out_size, dtype=np.float64)
    src = (o + 0.5) * scale - 0.5
    src = np.maximum(src, 0.0)                       # PyTorch clamps negative source coords
    i0 = np.minimum(np.floor(src).astype(np.int64), in_size - 1)
    i1 = np.minimum(i0 + 1, in_size - 1)
    l1 = src - i0
    l0 = 1.0 - l1
    w = np.zeros((out_size, in_size), dtype=np.float64)
    rows = np.arange(out_size)
    np.add.at(w, (rows, i0), l0)
    np.add.at(w, (rows, i1), l1)
    return w


def fused_resize_threshold(x, wh, wwt, logit_t):
    """Fused (composed) bilinear resize + threshold.

    x:   [N, H_in, W_in] float32 mask logits
    wh:  [OH, H_in]      float32 height operator (composed)
    wwt: [W_in, OW]      float32 width operator (composed, pre-transposed)
    Returns [N, OH, OW] bool:  sigmoid(resize(x)) > threshold  (as  y > logit_t).
    """
    N, H_in, W_in = x.shape
    OH = wh.shape[0]
    OW = wwt.shape[1]

    # ---- static alignment / tiling -----------------------------------------
    H_in_p = _round_up(H_in, 8)          # sublane alignment -> reshape trick stays a no-op
    OW_p = _round_up(OW, 128)            # lane-dense output stores (no vst.msk)
    # Output-row tile: multiple of 32 for clean int8 tiling, bounded so the
    # double-buffered output block stays small even for full-resolution masks.
    if OH <= 512:
        tile_oh = _round_up(OH, 32)
    else:
        tile_oh = 512
    OH_p = _round_up(OH, tile_oh)

    # Masks per grid step: largest divisor of N keeping MXU M-dim filled and VMEM bounded
    # (budget sized conservatively against v7x's 64 MiB physical VMEM).
    nb = 1
    for d in range(1, N + 1):
        if N % d:
            continue
        vmem_bytes = (2 * d * H_in_p * W_in * 4        # x block (double-buffered)
                      + 2 * d * tile_oh * OW_p         # int8 out block (double-buffered)
                      + d * H_in_p * OW_p * 4          # in-kernel f32 temp
                      + tile_oh * H_in_p * 4           # wh block
                      + W_in * OW_p * 4)               # wwt block
        if d * H_in_p <= 1024 and vmem_bytes <= 24 * 1024 * 1024:
            nb = d

    # ---- host-side zero padding (exact: padded weight rows/cols are zero) ---
    wh_p = np.zeros((OH_p, H_in_p), np.float32)
    wh_p[:OH, :H_in] = wh
    wwt_p = np.zeros((W_in, OW_p), np.float32)
    wwt_p[:, :OW] = wwt
    if H_in_p != H_in:
        x = jnp.pad(x, ((0, 0), (0, H_in_p - H_in), (0, 0)))

    thr = np.float32(logit_t)

    def kernel(x_ref, wwt_ref, wh_ref, o_ref):
        nb_, hi, wi = x_ref.shape
        # Width resize for all nb masks at once: M = nb*H_in fills the MXU.
        xw = jnp.dot(x_ref[...].reshape(nb_ * hi, wi), wwt_ref[...],
                     preferred_element_type=jnp.float32)             # [nb*hi, OW_p]
        wh_blk = wh_ref[...]                                          # [tile_oh, H_in_p]
        for n in range(nb_):                                          # static unroll, nb small
            y = jnp.dot(wh_blk, xw[n * hi:(n + 1) * hi, :],
                        preferred_element_type=jnp.float32)           # [tile_oh, OW_p]
            o_ref[n] = (y > thr).astype(jnp.int8)

    out = pl.pallas_call(
        kernel,
        out_shape=jax.ShapeDtypeStruct((N, OH_p, OW_p), jnp.int8),
        grid_spec=pltpu.PrefetchScalarGridSpec(
            num_scalar_prefetch=0,
            grid=(N // nb, OH_p // tile_oh),
            in_specs=[
                pl.BlockSpec((nb, H_in_p, W_in), lambda i, r: (i, 0, 0)),
                pl.BlockSpec((W_in, OW_p), lambda i, r: (0, 0)),
                pl.BlockSpec((tile_oh, H_in_p), lambda i, r: (r, 0)),
            ],
            out_specs=pl.BlockSpec((nb, tile_oh, OW_p), lambda i, r: (i, r, 0)),
        ),
        compiler_params=pltpu.CompilerParams(
            dimension_semantics=("parallel", "parallel"),
        ),
    )(x, jnp.asarray(wwt_p), jnp.asarray(wh_p))

    # Crop alignment padding + view as bool (single fused slice+convert in XLA).
    return out[:, :OH, :OW].astype(bool)


def post_process_segm(results, outputs, orig_target_sizes, max_target_sizes, threshold=0.5):
    """JAX/Pallas equivalent of PostProcessSegm.forward (homogeneous-size batch path)."""
    max_sizes = np.asarray(max_target_sizes)
    orig_sizes = np.asarray(orig_target_sizes)
    assert len(orig_sizes) == len(max_sizes)

    max_h, max_w = [int(v) for v in max_sizes.max(0)]
    min_h, min_w = [int(v) for v in max_sizes.min(0)]
    min_oh, min_ow = [int(v) for v in orig_sizes.min(0)]
    max_oh, max_ow = [int(v) for v in orig_sizes.max(0)]

    if not (min_h == max_h and min_w == max_w and min_oh == max_oh and min_ow == max_ow):
        # TODO(synk): the per-image crop + resize branch has data-dependent output shapes
        # (different (oh, ow) per sample), which cannot be expressed with static
        # Pallas/JAX shapes; only the homogeneous-batch path is implemented.
        raise NotImplementedError("heterogeneous per-image target sizes not supported")

    pred_masks = outputs["pred_masks"]               # [B, Q, 1, H_in, W_in]
    B, Q, _, H_in, W_in = pred_masks.shape
    x = jnp.reshape(pred_masks, (B * Q, H_in, W_in)).astype(jnp.float32)

    # Compose the two bilinear resizes into single per-axis operators (exact, in f64):
    #   out = (Wh2 @ Wh1) @ X @ (Ww2 @ Ww1)^T
    wh1 = bilinear_weight_matrix(H_in, max_h)        # [max_h, H_in]
    ww1 = bilinear_weight_matrix(W_in, max_w)        # [max_w, W_in]
    wh2 = bilinear_weight_matrix(max_h, min_oh)      # [oh, max_h]
    ww2 = bilinear_weight_matrix(max_w, min_ow)      # [ow, max_w]
    wh = (wh2 @ wh1).astype(np.float32)              # [oh, H_in]
    wwt = np.ascontiguousarray((ww2 @ ww1).T).astype(np.float32)   # [W_in, ow]

    # sigmoid(y) > t  <=>  y > logit(t)   (sigmoid is strictly monotone)
    t = float(threshold)
    if t <= 0.0:
        logit_t = -np.inf
    elif t >= 1.0:
        logit_t = np.inf
    else:
        logit_t = math.log(t / (1.0 - t))

    masks = fused_resize_threshold(x, wh, wwt, logit_t)            # [B*Q, oh, ow] bool
    masks = masks.reshape(B, Q, 1, min_oh, min_ow)                 # .unsqueeze(1) equivalent

    for i in range(B):
        results[i]["masks"] = masks[i]
    return results


if __name__ == "__main__":
    key = jax.random.PRNGKey(0)
    B, Q, H_in, W_in = 2, 4, 16, 16

    pred_masks = jax.random.normal(key, (B, Q, 1, H_in, W_in), dtype=jnp.float32)
    outputs = {"pred_masks": pred_masks}

    # Homogeneous batch (all padded / original sizes equal).
    max_target_sizes = jnp.array([[24, 24], [24, 24]], dtype=jnp.int32)
    orig_target_sizes = jnp.array([[32, 32], [32, 32]], dtype=jnp.int32)

    # Dummy `results` as produced by PostProcess (contents irrelevant here).
    results = [{"scores": jnp.zeros((Q,)), "labels": jnp.zeros((Q,), jnp.int32),
                "boxes": jnp.zeros((Q, 4))} for _ in range(B)]

    results = post_process_segm(results, outputs, orig_target_sizes, max_target_sizes,
                                threshold=0.5)

    for r in results:
        jax.block_until_ready(r["masks"])

    # Basic sanity checks on shape/dtype.
    assert results[0]["masks"].shape == (Q, 1, 32, 32)
    assert results[0]["masks"].dtype == jnp.bool_

    print("KERNEL_OK")
</pallas_src>

<mosaic_0001>
module attributes {stable_mosaic.version = 11 : i64} {
  func.func @kernel(%arg0: i32, %arg1: i32, %arg2: memref<8x16x16xf32, #tpu.memory_space<vmem>>, %arg3: memref<16x128xf32, #tpu.memory_space<vmem>>, %arg4: memref<32x16xf32, #tpu.memory_space<vmem>>, %arg5: memref<8x32x128xi8, #tpu.memory_space<vmem>>) attributes {dimension_semantics = [#tpu.dimension_semantics<parallel>, #tpu.dimension_semantics<parallel>], iteration_bounds = array<i64: 1, 1>, scalar_prefetch = 0 : i64, scratch_operands = 0 : i64, tpu.core_type = #tpu.core_type<tc>, window_params = [{transform_indices = @transform_0, window_bounds = array<i64: 8, 16, 16>}, {pipeline_mode = #tpu.pipeline_mode<synchronous>, transform_indices = @transform_1, window_bounds = array<i64: 16, 128>}, {transform_indices = @transform_2, window_bounds = array<i64: 32, 16>}, {transform_indices = @transform_3, window_bounds = array<i64: 8, 32, 128>}]} {
    %c0 = arith.constant 0 : index
    %c0_0 = arith.constant 0 : index
    %c0_1 = arith.constant 0 : index
    %0 = vector.load %arg2[%c0, %c0_0, %c0_1] : memref<8x16x16xf32, #tpu.memory_space<vmem>>, vector<8x16x16xf32>
    %1 = vector.shape_cast %0 : vector<8x16x16xf32> to vector<128x16xf32>
    %c0_2 = arith.constant 0 : index
    %c0_3 = arith.constant 0 : index
    %2 = vector.load %arg3[%c0_2, %c0_3] : memref<16x128xf32, #tpu.memory_space<vmem>>, vector<16x128xf32>
    %cst = arith.constant dense<0.000000e+00> : vector<128x128xf32>
    %3 = tpu.matmul %1, %2, %cst {dimension_numbers = #tpu.dot_dimension_numbers<[1], [0], [0], [1], [0, 0, 1, 1], [], []>} : vector<128x16xf32>, vector<16x128xf32>, vector<128x128xf32> -> vector<128x128xf32>
    %c0_4 = arith.constant 0 : index
    %c0_5 = arith.constant 0 : index
    %4 = vector.load %arg4[%c0_4, %c0_5] : memref<32x16xf32, #tpu.memory_space<vmem>>, vector<32x16xf32>
    %5 = vector.extract_strided_slice %3 {offsets = [0, 0], sizes = [16, 128], strides = [1, 1]} : vector<128x128xf32> to vector<16x128xf32>
    %cst_6 = arith.constant dense<0.000000e+00> : vector<32x128xf32>
    %6 = tpu.matmul %4, %5, %cst_6 {dimension_numbers = #tpu.dot_dimension_numbers<[1], [0], [0], [1], [0, 0, 1, 1], [], []>} : vector<32x16xf32>, vector<16x128xf32>, vector<32x128xf32> -> vector<32x128xf32>
    %cst_7 = arith.constant 0.000000e+00 : f32
    %7 = vector.broadcast %cst_7 : f32 to vector<32x128xf32>
    %8 = arith.cmpf ogt, %6, %7 : vector<32x128xf32>
    %9 = arith.extui %8 : vector<32x128xi1> to vector<32x128xi8>
    %c0_8 = arith.constant 0 : index
    %c0_9 = arith.constant 0 : index
    %c0_10 = arith.constant 0 : index
    %10 = vector.load %arg5[%c0_8, %c0_9, %c0_10] : memref<8x32x128xi8, #tpu.memory_space<vmem>>, vector<1x32x128xi8>
    %11 = vector.shape_cast %10 : vector<1x32x128xi8> to vector<32x128xi8>
    %12 = vector.shape_cast %9 : vector<32x128xi8> to vector<1x32x128xi8>
    tpu.vector_store %arg5[%c0_8, %c0_9, %c0_10], %12 {strides = array<i32>} : memref<8x32x128xi8, #tpu.memory_space<vmem>>, vector<1x32x128xi8>,
    %13 = vector.extract_strided_slice %3 {offsets = [16, 0], sizes = [16, 128], strides = [1, 1]} : vector<128x128xf32> to vector<16x128xf32>
    %cst_11 = arith.constant dense<0.000000e+00> : vector<32x128xf32>
    %14 = tpu.matmul %4, %13, %cst_11 {dimension_numbers = #tpu.dot_dimension_numbers<[1], [0], [0], [1], [0, 0, 1, 1], [], []>} : vector<32x16xf32>, vector<16x128xf32>, vector<32x128xf32> -> vector<32x128xf32>
    %cst_12 = arith.constant 0.000000e+00 : f32
    %15 = vector.broadcast %cst_12 : f32 to vector<32x128xf32>
    %16 = arith.cmpf ogt, %14, %15 : vector<32x128xf32>
    %17 = arith.extui %16 : vector<32x128xi1> to vector<32x128xi8>
    %c1 = arith.constant 1 : index
    %c0_13 = arith.constant 0 : index
    %c0_14 = arith.constant 0 : index
    %18 = vector.load %arg5[%c1, %c0_13, %c0_14] : memref<8x32x128xi8, #tpu.memory_space<vmem>>, vector<1x32x128xi8>
    %19 = vector.shape_cast %18 : vector<1x32x128xi8> to vector<32x128xi8>
    %20 = vector.shape_cast %17 : vector<32x128xi8> to vector<1x32x128xi8>
    tpu.vector_store %arg5[%c1, %c0_13, %c0_14], %20 {strides = array<i32>} : memref<8x32x128xi8, #tpu.memory_space<vmem>>, vector<1x32x128xi8>,
    %21 = vector.extract_strided_slice %3 {offsets = [32, 0], sizes = [16, 128], strides = [1, 1]} : vector<128x128xf32> to vector<16x128xf32>
    %cst_15 = arith.constant dense<0.000000e+00> : vector<32x128xf32>
    %22 = tpu.matmul %4, %21, %cst_15 {dimension_numbers = #tpu.dot_dimension_numbers<[1], [0], [0], [1], [0, 0, 1, 1], [], []>} : vector<32x16xf32>, vector<16x128xf32>, vector<32x128xf32> -> vector<32x128xf32>
    %cst_16 = arith.constant 0.000000e+00 : f32
    %23 = vector.broadcast %cst_16 : f32 to vector<32x128xf32>
    %24 = arith.cmpf ogt, %22, %23 : vector<32x128xf32>
    %25 = arith.extui %24 : vector<32x128xi1> to vector<32x128xi8>
    %c2 = arith.constant 2 : index
    %c0_17 = arith.constant 0 : index
    %c0_18 = arith.constant 0 : index
    %26 = vector.load %arg5[%c2, %c0_17, %c0_18] : memref<8x32x128xi8, #tpu.memory_space<vmem>>, vector<1x32x128xi8>
    %27 = vector.shape_cast %26 : vector<1x32x128xi8> to vector<32x128xi8>
    %28 = vector.shape_cast %25 : vector<32x128xi8> to vector<1x32x128xi8>
    tpu.vector_store %arg5[%c2, %c0_17, %c0_18], %28 {strides = array<i32>} : memref<8x32x128xi8, #tpu.memory_space<vmem>>, vector<1x32x128xi8>,
    %29 = vector.extract_strided_slice %3 {offsets = [48, 0], sizes = [16, 128], strides = [1, 1]} : vector<128x128xf32> to vector<16x128xf32>
    %cst_19 = arith.constant dense<0.000000e+00> : vector<32x128xf32>
    %30 = tpu.matmul %4, %29, %cst_19 {dimension_numbers = #tpu.dot_dimension_numbers<[1], [0], [0], [1], [0, 0, 1, 1], [], []>} : vector<32x16xf32>, vector<16x128xf32>, vector<32x128xf32> -> vector<32x128xf32>
    %cst_20 = arith.constant 0.000000e+00 : f32
    %31 = vector.broadcast %cst_20 : f32 to vector<32x128xf32>
    %32 = arith.cmpf ogt, %30, %31 : vector<32x128xf32>
    %33 = arith.extui %32 : vector<32x128xi1> to vector<32x128xi8>
    %c3 = arith.constant 3 : index
    %c0_21 = arith.constant 0 : index
    %c0_22 = arith.constant 0 : index
    %34 = vector.load %arg5[%c3, %c0_21, %c0_22] : memref<8x32x128xi8, #tpu.memory_space<vmem>>, vector<1x32x128xi8>
    %35 = vector.shape_cast %34 : vector<1x32x128xi8> to vector<32x128xi8>
    %36 = vector.shape_cast %33 : vector<32x128xi8> to vector<1x32x128xi8>
    tpu.vector_store %arg5[%c3, %c0_21, %c0_22], %36 {strides = array<i32>} : memref<8x32x128xi8, #tpu.memory_space<vmem>>, vector<1x32x128xi8>,
    %37 = vector.extract_strided_slice %3 {offsets = [64, 0], sizes = [16, 128], strides = [1, 1]} : vector<128x128xf32> to vector<16x128xf32>
    %cst_23 = arith.constant dense<0.000000e+00> : vector<32x128xf32>
    %38 = tpu.matmul %4, %37, %cst_23 {dimension_numbers = #tpu.dot_dimension_numbers<[1], [0], [0], [1], [0, 0, 1, 1], [], []>} : vector<32x16xf32>, vector<16x128xf32>, vector<32x128xf32> -> vector<32x128xf32>
    %cst_24 = arith.constant 0.000000e+00 : f32
    %39 = vector.broadcast %cst_24 : f32 to vector<32x128xf32>
    %40 = arith.cmpf ogt, %38, %39 : vector<32x128xf32>
    %41 = arith.extui %40 : vector<32x128xi1> to vector<32x128xi8>
    %c4 = arith.constant 4 : index
    %c0_25 = arith.constant 0 : index
    %c0_26 = arith.constant 0 : index
    %42 = vector.load %arg5[%c4, %c0_25, %c0_26] : memref<8x32x128xi8, #tpu.memory_space<vmem>>, vector<1x32x128xi8>
    %43 = vector.shape_cast %42 : vector<1x32x128xi8> to vector<32x128xi8>
    %44 = vector.shape_cast %41 : vector<32x128xi8> to vector<1x32x128xi8>
    tpu.vector_store %arg5[%c4, %c0_25, %c0_26], %44 {strides = array<i32>} : memref<8x32x128xi8, #tpu.memory_space<vmem>>, vector<1x32x128xi8>,
    %45 = vector.extract_strided_slice %3 {offsets = [80, 0], sizes = [16, 128], strides = [1, 1]} : vector<128x128xf32> to vector<16x128xf32>
    %cst_27 = arith.constant dense<0.000000e+00> : vector<32x128xf32>
    %46 = tpu.matmul %4, %45, %cst_27 {dimension_numbers = #tpu.dot_dimension_numbers<[1], [0], [0], [1], [0, 0, 1, 1], [], []>} : vector<32x16xf32>, vector<16x128xf32>, vector<32x128xf32> -> vector<32x128xf32>
    %cst_28 = arith.constant 0.000000e+00 : f32
    %47 = vector.broadcast %cst_28 : f32 to vector<32x128xf32>
    %48 = arith.cmpf ogt, %46, %47 : vector<32x128xf32>
    %49 = arith.extui %48 : vector<32x128xi1> to vector<32x128xi8>
    %c5 = arith.constant 5 : index
    %c0_29 = arith.constant 0 : index
    %c0_30 = arith.constant 0 : index
    %50 = vector.load %arg5[%c5, %c0_29, %c0_30] : memref<8x32x128xi8, #tpu.memory_space<vmem>>, vector<1x32x128xi8>
    %51 = vector.shape_cast %50 : vector<1x32x128xi8> to vector<32x128xi8>
    %52 = vector.shape_cast %49 : vector<32x128xi8> to vector<1x32x128xi8>
    tpu.vector_store %arg5[%c5, %c0_29, %c0_30], %52 {strides = array<i32>} : memref<8x32x128xi8, #tpu.memory_space<vmem>>, vector<1x32x128xi8>,
    %53 = vector.extract_strided_slice %3 {offsets = [96, 0], sizes = [16, 128], strides = [1, 1]} : vector<128x128xf32> to vector<16x128xf32>
    %cst_31 = arith.constant dense<0.000000e+00> : vector<32x128xf32>
    %54 = tpu.matmul %4, %53, %cst_31 {dimension_numbers = #tpu.dot_dimension_numbers<[1], [0], [0], [1], [0, 0, 1, 1], [], []>} : vector<32x16xf32>, vector<16x128xf32>, vector<32x128xf32> -> vector<32x128xf32>
    %cst_32 = arith.constant 0.000000e+00 : f32
    %55 = vector.broadcast %cst_32 : f32 to vector<32x128xf32>
    %56 = arith.cmpf ogt, %54, %55 : vector<32x128xf32>
    %57 = arith.extui %56 : vector<32x128xi1> to vector<32x128xi8>
    %c6 = arith.constant 6 : index
    %c0_33 = arith.constant 0 : index
    %c0_34 = arith.constant 0 : index
    %58 = vector.load %arg5[%c6, %c0_33, %c0_34] : memref<8x32x128xi8, #tpu.memory_space<vmem>>, vector<1x32x128xi8>
    %59 = vector.shape_cast %58 : vector<1x32x128xi8> to vector<32x128xi8>
    %60 = vector.shape_cast %57 : vector<32x128xi8> to vector<1x32x128xi8>
    tpu.vector_store %arg5[%c6, %c0_33, %c0_34], %60 {strides = array<i32>} : memref<8x32x128xi8, #tpu.memory_space<vmem>>, vector<1x32x128xi8>,
    %61 = vector.extract_strided_slice %3 {offsets = [112, 0], sizes = [16, 128], strides = [1, 1]} : vector<128x128xf32> to vector<16x128xf32>
    %cst_35 = arith.constant dense<0.000000e+00> : vector<32x128xf32>
    %62 = tpu.matmul %4, %61, %cst_35 {dimension_numbers = #tpu.dot_dimension_numbers<[1], [0], [0], [1], [0, 0, 1, 1], [], []>} : vector<32x16xf32>, vector<16x128xf32>, vector<32x128xf32> -> vector<32x128xf32>
    %cst_36 = arith.constant 0.000000e+00 : f32
    %63 = vector.broadcast %cst_36 : f32 to vector<32x128xf32>
    %64 = arith.cmpf ogt, %62, %63 : vector<32x128xf32>
    %65 = arith.extui %64 : vector<32x128xi1> to vector<32x128xi8>
    %c7 = arith.constant 7 : index
    %c0_37 = arith.constant 0 : index
    %c0_38 = arith.constant 0 : index
    %66 = vector.load %arg5[%c7, %c0_37, %c0_38] : memref<8x32x128xi8, #tpu.memory_space<vmem>>, vector<1x32x128xi8>
    %67 = vector.shape_cast %66 : vector<1x32x128xi8> to vector<32x128xi8>
    %68 = vector.shape_cast %65 : vector<32x128xi8> to vector<1x32x128xi8>
    tpu.vector_store %arg5[%c7, %c0_37, %c0_38], %68 {strides = array<i32>} : memref<8x32x128xi8, #tpu.memory_space<vmem>>, vector<1x32x128xi8>,
    return
  }
  func.func @transform_0(%arg0: i32, %arg1: i32) -> (i32, i32, i32) {
    %c0_i32 = arith.constant 0 : i32
    %c0_i32_0 = arith.constant 0 : i32
    %c0_i32_1 = arith.constant 0 : i32
    return %arg0, %c0_i32, %c0_i32_0 : i32, i32, i32
  }
  func.func @transform_1(%arg0: i32, %arg1: i32) -> (i32, i32) {
    %c0_i32 = arith.constant 0 : i32
    %c0_i32_0 = arith.constant 0 : i32
    %c0_i32_1 = arith.constant 0 : i32
    return %c0_i32, %c0_i32_0 : i32, i32
  }
  func.func @transform_2(%arg0: i32, %arg1: i32) -> (i32, i32) {
    %c0_i32 = arith.constant 0 : i32
    %c0_i32_0 = arith.constant 0 : i32
    return %arg1, %c0_i32 : i32, i32
  }
  func.func @transform_3(%arg0: i32, %arg1: i32) -> (i32, i32, i32) {
    %c0_i32 = arith.constant 0 : i32
    %c0_i32_0 = arith.constant 0 : i32
    return %arg0, %arg1, %c0_i32 : i32, i32, i32
  }
}

</mosaic_0001>

<bundles_post_ra>
// kernel: tpu_custom_call.1
= control target key start
LH: loop header
LB: loop body
LE: loop exit
PB: predicated region body
PF: predicated region fallthrough
CT: control target
= control target key end

     0   :  { %8 = vsyncpa [#allocation3], 0  ;;  %s1457_s0 = inlined_call_operand.hbm [shape: f32[8,16,16], index: 0, kind: input, shape index: {}]   ;;  %s1458_s1 = inlined_call_operand.vmem [shape: f32[16,128], index: 1, kind: input, shape index: {}]   ;;  %s1459_s2 = inlined_call_operand.vmem [shape: f32[32,16], index: 2, kind: input, shape index: {}]   ;;  %s1460_s3 = inlined_call_operand.hbm [shape: s8[8,32,128], index: 3, kind: output, shape index: {}]  }
   0x1   :  { %9 = vsyncpa [#allocation4], 0  ;;  %s1306_s12 = smov [#allocation2]  }
   0x2   :  { %s15_s13 = sshll.u32 %s1306_s12, 4  ;;  %s16_s13 = int_to_ptr.vmem [resolvable:$true] %s15_s13 }
   0x3   :  { %s1270_s14 = scalar_lea.vmem %s16_s13, 2048  ;;  %p1275_p1 = scmp.lt.s32.totalorder %s16_s13, %s16_s13 }
   0x4   :  { %p1271_p0 = scmp.ne.s32.totalorder %s16_s13, %s1270_s14  ;;  %p1276_p2 = scmp.lt.s32.totalorder %s1270_s14, %s1270_s14 }
   0x6   :  { %p1277_p3 = por %p1276_p2, %p1275_p1 }
   0x8   :  { %p1278_p4 = pnand %p1277_p3, %p1271_p0 }
   0xa   :  { %1281 = shalt.err (!%p1278_p4)
}
   0xb   :  { %s1307_s15 = smov 128   ;;  %s1308_s16 = smov 8  }
   0xc   :  { %21 = dma.hbm_to_vmem [thread:$0]  %s1457_s0, 2048, %s16_s13, [#allocation3], %s1307_s15, %s1307_s15, %s1308_s16  }
   0xd   :  { %1302 = dma.done.wait [#allocation3], 2048  }
   0xe   :  { %1303 = vsyncadd [#allocation3], 4294965248  ;;  %vm49_vm0 = vcmask 130048   ;;  %v48_v0 = vld [vmem:[%s1458_s1 + $0x8] sm:$0xff]  ;;  %v47_v1 = vld [vmem:[%s1458_s1] sm:$0xff]  ;;  %v1309_v43 = vmov 0  }
   0xf   :  { %v31_v2 = vld [vmem:[#allocation2] sm:$0xff]  ;;  %1149 = vmatprep.subr.mxu0 %v48_v0  ;;  %v32_v3 = vld [vmem:[#allocation2 + $0x8] sm:$0xff]  ;;  %v33_v4 = vld [vmem:[#allocation2 + $0x10] sm:$0xff] }
  0x10   :  { %1153 = vmatprep.mubr.msk.f32.mxu0 %vm49_vm0, %v31_v2  ;;  %1150 = vmatpush3.msra.mxu0 %v48_v0  ;;  %v34_v5 = vld [vmem:[#allocation2 + $0x18] sm:$0xff]  ;;  %v35_v6 = vld [vmem:[#allocation2 + $0x20] sm:$0xff]  ;;  %v36_v7 = vld [vmem:[#allocation2 + $0x28] sm:$0xff] }
  0x11   :  { %1151 = vmatprep.subr.mxu0 %v47_v1  ;;  %v37_v8 = vld [vmem:[#allocation2 + $0x30] sm:$0xff]  ;;  %v38_v9 = vld [vmem:[#allocation2 + $0x38] sm:$0xff]  ;;  %v39_v10 = vld [vmem:[#allocation2 + $0x40] sm:$0xff] }
  0x12   :  { %1152 = vmatpush3.msra.mxu0 %v47_v1  ;;  %v40_v11 = vld [vmem:[#allocation2 + $0x48] sm:$0xff]  ;;  %v41_v12 = vld [vmem:[#allocation2 + $0x50] sm:$0xff]  ;;  %v42_v13 = vld [vmem:[#allocation2 + $0x58] sm:$0xff] }
  0x13   :  { %1154 = vmatmul.mubr.msk.f32.vlgmr.msra.gmra.mxu0 %vm49_vm0, %v32_v3  ;;  %v43_v14 = vld [vmem:[#allocation2 + $0x60] sm:$0xff]  ;;  %v44_v15 = vld [vmem:[#allocation2 + $0x68] sm:$0xff]  ;;  %v45_v16 = vld [vmem:[#allocation2 + $0x70] sm:$0xff] }
  0x14   :  { %1156 = vmatprep.mubr.msk.f32.mxu0 %vm49_vm0, %v33_v4  ;;  %v46_v17 = vld [vmem:[#allocation2 + $0x78] sm:$0xff]  ;;  %v1362_v18 = vld [vmem:[%s1459_s2] sm:$0xff]  ;;  %v1371_v21 = vld [vmem:[%s1459_s2 + $0x8] sm:$0xff] }
  0x15   :  { %1181 = vmatprep.mubr.msk.f32.mxu1 %vm49_vm0, %v1362_v18  ;;  %v1376_v22 = vld [vmem:[%s1459_s2 + $0x10] sm:$0xff]  ;;  %v1385_v25 = vld [vmem:[%s1459_s2 + $0x18] sm:$0xff]  ;;  %s1310_s2 = smov [#allocation5]  }
  0x16   :  { %s1023_s29 = sshll.u32 %s1310_s2, 4  ;;  %s1024_s29 = int_to_ptr.vmem [resolvable:$true] %s1023_s29 }
  0x17   :  { %1157 = vmatmul.mubr.msk.f32.gmra.mxu0 %vm49_vm0, %v34_v5  ;;  %s1282_s30 = scalar_lea.vmem %s1024_s29, 1024  ;;  %p1287_p6 = scmp.lt.s32.totalorder %s1024_s29, %s1024_s29 }
  0x18   :  { %1159 = vmatprep.mubr.msk.f32.mxu0 %vm49_vm0, %v35_v6  ;;  %p1283_p5 = scmp.ne.s32.totalorder %s1024_s29, %s1282_s30  ;;  %p1288_p7 = scmp.lt.s32.totalorder %s1282_s30, %s1282_s30 }
  0x1a   :  { %p1289_p8 = por %p1288_p7, %p1287_p6 }
  0x1b   :  { %1160 = vmatmul.mubr.msk.f32.gmra.mxu0 %vm49_vm0, %v36_v7 }
  0x1c   :  { %1162 = vmatprep.mubr.msk.f32.mxu0 %vm49_vm0, %v37_v8  ;;  %p1290_p9 = pnand %p1289_p8, %p1283_p5 }
  0x1f   :  { %1163 = vmatmul.mubr.msk.f32.gmra.mxu0 %vm49_vm0, %v38_v9 }
  0x20   :  { %1165 = vmatprep.mubr.msk.f32.mxu0 %vm49_vm0, %v39_v10 }
  0x23   :  { %1166 = vmatmul.mubr.msk.f32.gmra.mxu0 %vm49_vm0, %v40_v11 }
  0x24   :  { %1168 = vmatprep.mubr.msk.f32.mxu0 %vm49_vm0, %v41_v12 }
  0x27   :  { %1169 = vmatmul.mubr.msk.f32.gmra.mxu0 %vm49_vm0, %v42_v13 }
  0x28   :  { %1171 = vmatprep.mubr.msk.f32.mxu0 %vm49_vm0, %v43_v14 }
  0x2b   :  { %1172 = vmatmul.mubr.msk.f32.gmra.mxu0 %vm49_vm0, %v44_v15 }
  0x2c   :  { %1174 = vmatprep.mubr.msk.f32.mxu0 %vm49_vm0, %v45_v16 }
  0x2f   :  { %1175 = vmatmul.mubr.msk.f32.gmra.mxu0 %vm49_vm0, %v46_v17 }
  0x30   :  { %1221 = vmatprep.mubr.msk.f32.mxu0 %vm49_vm0, %v1362_v18 }
  0xd3   :  { %v1155_v19 = vpop.f32.mrf.mxu0 }
  0xd4   :  { %1177 = vmatprep.subr.mxu1 %v1155_v19 }
  0xd5   :  { %v164_v20 = vpop.f32.mrf.mxu0  ;;  %1178 = vmatpush3.msra.mxu1 %v1155_v19 }
  0xd6   :  { %1179 = vmatprep.subr.mxu1 %v164_v20 }
  0xd7   :  { %v1158_v23 = vpop.f32.mrf.mxu0  ;;  %1180 = vmatpush3.msra.mxu1 %v164_v20 }
  0xd8   :  { %1182 = vmatmul.mubr.msk.f32.vlgmr.msra.gmra.mxu1 %vm49_vm0, %v1371_v21  ;;  %1187 = vmatprep.subr.mxu1 %v1158_v23 }
  0xd9   :  { %v174_v24 = vpop.f32.mrf.mxu0  ;;  %1188 = vmatpush3.msra.mxu1 %v1158_v23  ;;  %1184 = vmatprep.mubr.msk.f32.mxu1 %vm49_vm0, %v1376_v22 }
  0xda   :  { %1189 = vmatprep.subr.mxu1 %v174_v24 }
  0xdb   :  { %v1161_v26 = vpop.f32.mrf.mxu0  ;;  %1190 = vmatpush3.msra.mxu1 %v174_v24 }
  0xdc   :  { %1185 = vmatmul.mubr.msk.f32.gmra.mxu1 %vm49_vm0, %v1385_v25  ;;  %1197 = vmatprep.subr.mxu1 %v1161_v26 }
  0xdd   :  { %v184_v27 = vpop.f32.mrf.mxu0  ;;  %1191 = vmatprep.mubr.msk.f32.mxu1 %vm49_vm0, %v1362_v18 }
  0xdf   :  { %v1164_v28 = vpop.f32.mrf.mxu0 }
  0xe0   :  { %1192 = vmatmul.mubr.msk.f32.vlgmr.msra.gmra.mxu1 %vm49_vm0, %v1371_v21 }
  0xe1   :  { %1198 = vmatpush3.msra.mxu1 %v1161_v26  ;;  %v194_v29 = vpop.f32.mrf.mxu0  ;;  %1194 = vmatprep.mubr.msk.f32.mxu1 %vm49_vm0, %v1376_v22 }
  0xe2   :  { %1199 = vmatprep.subr.mxu1 %v184_v27 }
  0xe3   :  { %1200 = vmatpush3.msra.mxu1 %v184_v27  ;;  %v1167_v30 = vpop.f32.mrf.mxu0 }
  0xe4   :  { %1207 = vmatprep.subr.mxu1 %v1164_v28  ;;  %1195 = vmatmul.mubr.msk.f32.gmra.mxu1 %vm49_vm0, %v1385_v25 }
  0xe5   :  { %1217 = vmatprep.subr.mxu0 %v1167_v30  ;;  %v204_v31 = vpop.f32.mrf.mxu0  ;;  %1201 = vmatprep.mubr.msk.f32.mxu1 %vm49_vm0, %v1362_v18 }
  0xe6   :  { %1218 = vmatpush3.msra.mxu0 %v1167_v30 }
  0xe7   :  { %1219 = vmatprep.subr.mxu0 %v204_v31  ;;  %v1170_v32 = vpop.f32.mrf.mxu0 }
  0xe8   :  { %1220 = vmatpush3.msra.mxu0 %v204_v31  ;;  %1202 = vmatmul.mubr.msk.f32.vlgmr.msra.gmra.mxu1 %vm49_vm0, %v1371_v21 }
  0xe9   :  { %1208 = vmatpush3.msra.mxu1 %v1164_v28  ;;  %1204 = vmatprep.mubr.msk.f32.mxu1 %vm49_vm0, %v1376_v22  ;;  %v214_v33 = vpop.f32.mrf.mxu0 }
  0xea   :  { %1209 = vmatprep.subr.mxu1 %v194_v29  ;;  %1222 = vmatmul.mubr.msk.f32.vlgmr.msra.gmra.mxu0 %vm49_vm0, %v1371_v21 }
  0xeb   :  { %1210 = vmatpush3.msra.mxu1 %v194_v29  ;;  %v1173_v34 = vpop.f32.mrf.mxu0  ;;  %1224 = vmatprep.mubr.msk.f32.mxu0 %vm49_vm0, %v1376_v22 }
  0xec   :  { %1205 = vmatmul.mubr.msk.f32.gmra.mxu1 %vm49_vm0, %v1385_v25  ;;  %1227 = vmatprep.subr.mxu1 %v1170_v32 }
  0xed   :  { %1211 = vmatprep.mubr.msk.f32.mxu1 %vm49_vm0, %v1362_v18  ;;  %1237 = vmatprep.subr.mxu0 %v1173_v34  ;;  %v224_v35 = vpop.f32.mrf.mxu0 }
  0xee   :  { %1238 = vmatpush3.msra.mxu0 %v1173_v34 }
  0xef   :  { %1239 = vmatprep.subr.mxu0 %v224_v35  ;;  %1225 = vmatmul.mubr.msk.f32.gmra.mxu0 %vm49_vm0, %v1385_v25  ;;  %v1176_v36 = vpop.f32.mrf.mxu0 }
  0xf0   :  { %1212 = vmatmul.mubr.msk.f32.vlgmr.msra.gmra.mxu1 %vm49_vm0, %v1371_v21  ;;  %1240 = vmatpush3.msra.mxu0 %v224_v35 }
  0xf1   :  { %1214 = vmatprep.mubr.msk.f32.mxu1 %vm49_vm0, %v1376_v22  ;;  %1228 = vmatpush3.msra.mxu1 %v1170_v32  ;;  %v234_v37 = vpop.f32.mrf.mxu0 }
  0xf2   :  { %1229 = vmatprep.subr.mxu1 %v214_v33  ;;  %1241 = vmatprep.mubr.msk.f32.mxu0 %vm49_vm0, %v1362_v18 }
  0xf3   :  { %1230 = vmatpush3.msra.mxu1 %v214_v33  ;;  %1242 = vmatmul.mubr.msk.f32.vlgmr.msra.gmra.mxu0 %vm49_vm0, %v1371_v21 }
  0xf4   :  { %1215 = vmatmul.mubr.msk.f32.gmra.mxu1 %vm49_vm0, %v1385_v25  ;;  %1247 = vmatprep.subr.mxu1 %v1176_v36 }
  0xf5   :  { %1231 = vmatprep.mubr.msk.f32.mxu1 %vm49_vm0, %v1362_v18  ;;  %1244 = vmatprep.mubr.msk.f32.mxu0 %vm49_vm0, %v1376_v22 }
  0xf7   :  { %1245 = vmatmul.mubr.msk.f32.gmra.mxu0 %vm49_vm0, %v1385_v25 }
  0xf8   :  { %1232 = vmatmul.mubr.msk.f32.vlgmr.msra.gmra.mxu1 %vm49_vm0, %v1371_v21 }
  0xf9   :  { %1234 = vmatprep.mubr.msk.f32.mxu1 %vm49_vm0, %v1376_v22  ;;  %1248 = vmatpush3.msra.mxu1 %v1176_v36 }
  0xfa   :  { %1249 = vmatprep.subr.mxu1 %v234_v37 }
  0xfb   :  { %1250 = vmatpush3.msra.mxu1 %v234_v37 }
  0xfc   :  { %1235 = vmatmul.mubr.msk.f32.gmra.mxu1 %vm49_vm0, %v1385_v25 }
  0xfd   :  { %1251 = vmatprep.mubr.msk.f32.mxu1 %vm49_vm0, %v1362_v18 }
 0x100   :  { %1252 = vmatmul.mubr.msk.f32.vlgmr.msra.gmra.mxu1 %vm49_vm0, %v1371_v21 }
 0x101   :  { %1254 = vmatprep.mubr.msk.f32.mxu1 %vm49_vm0, %v1376_v22 }
 0x104   :  { %1255 = vmatmul.mubr.msk.f32.gmra.mxu1 %vm49_vm0, %v1385_v25 }
 0x198   :  { %v1183_v38 = vpop.f32.mrf.mxu1 }
 0x199   :  { %vm345_vm2 = vcmp.gt.f32.partialorder %v1183_v38, 0.0 }
 0x19a   :  { %v325_v39 = vpop.f32.mrf.mxu1 }
 0x19b   :  { %vm344_vm1 = vcmp.gt.f32.partialorder %v325_v39, 0.0 }
 0x19c   :  { %v1186_v40 = vpop.f32.mrf.mxu1  ;;  %vm348_vm3 = vmpackc.low %vm345_vm2, %vm344_vm1 }
 0x19d   :  { %vm347_vm4 = vcmp.gt.f32.partialorder %v1186_v40, 0.0 }
 0x19e   :  { %v335_v41 = vpop.f32.mrf.mxu1 }
 0x19f   :  { %vm346_vm5 = vcmp.gt.f32.partialorder %v335_v41, 0.0 }
 0x1a0   :  { %vm349_vm6 = vmpackc.low %vm347_vm4, %vm346_vm5  ;;  %v1193_v42 = vpop.f32.mrf.mxu1 }
 0x1a1   :  { %vm350_vm7 = vmpackc.even %vm349_vm6, %vm348_vm3  ;;  %vm439_vm9 = vcmp.gt.f32.partialorder %v1193_v42, 0.0 }
 0x1a2   :  { %v351_v44 = vsel %vm350_vm7, 16843009, %v1309_v43  ;;  %v419_v45 = vpop.f32.mrf.mxu1 }
 0x1a3   :  { %352 = vst [vmem:[#allocation5] sm:$0xff] %v351_v44  ;;  %vm438_vm8 = vcmp.gt.f32.partialorder %v419_v45, 0.0 }
 0x1a4   :  { %v1196_v46 = vpop.f32.mrf.mxu1  ;;  %vm442_vm10 = vmpackc.low %vm439_vm9, %vm438_vm8 }
 0x1a5   :  { %vm441_vm11 = vcmp.gt.f32.partialorder %v1196_v46, 0.0 }
 0x1a6   :  { %v429_v47 = vpop.f32.mrf.mxu1 }
 0x1a7   :  { %vm440_vm12 = vcmp.gt.f32.partialorder %v429_v47, 0.0 }
 0x1a8   :  { %vm443_vm13 = vmpackc.low %vm441_vm11, %vm440_vm12  ;;  %v1203_v48 = vpop.f32.mrf.mxu1 }
 0x1a9   :  { %vm444_vm14 = vmpackc.even %vm443_vm13, %vm442_vm10  ;;  %vm534_vm0 = vcmp.gt.f32.partialorder %v1203_v48, 0.0 }
 0x1aa   :  { %v445_v49 = vsel %vm444_vm14, 16843009, %v1309_v43  ;;  %v514_v50 = vpop.f32.mrf.mxu1  ;;  %v1223_v51 = vpop.f32.mrf.mxu0 }
 0x1ab   :  { %447 = vst [vmem:[#allocation5 + $0x8] sm:$0xff] %v445_v49  ;;  %vm533_vm15 = vcmp.gt.f32.partialorder %v514_v50, 0.0  ;;  %vm724_vm4 = vcmp.gt.f32.partialorder %v1223_v51, 0.0 }
 0x1ac   :  { %v1206_v52 = vpop.f32.mrf.mxu1  ;;  %v704_v53 = vpop.f32.mrf.mxu0  ;;  %vm537_vm1 = vmpackc.low %vm534_vm0, %vm533_vm15 }
 0x1ad   :  { %vm536_vm2 = vcmp.gt.f32.partialorder %v1206_v52, 0.0  ;;  %vm723_vm5 = vcmp.gt.f32.partialorder %v704_v53, 0.0 }
 0x1ae   :  { %v524_v54 = vpop.f32.mrf.mxu1  ;;  %vm727_vm9 = vmpackc.low %vm724_vm4, %vm723_vm5 }
 0x1af   :  { %vm535_vm3 = vcmp.gt.f32.partialorder %v524_v54, 0.0  ;;  %v1226_v55 = vpop.f32.mrf.mxu0 }
 0x1b0   :  { %vm538_vm6 = vmpackc.low %vm536_vm2, %vm535_vm3  ;;  %v1213_v56 = vpop.f32.mrf.mxu1  ;;  %vm726_vm7 = vcmp.gt.f32.partialorder %v1226_v55, 0.0 }
 0x1b1   :  { %vm539_vm8 = vmpackc.even %vm538_vm6, %vm537_vm1  ;;  %v714_v57 = vpop.f32.mrf.mxu0  ;;  %vm629_vm14 = vcmp.gt.f32.partialorder %v1213_v56, 0.0 }
 0x1b2   :  { %v540_v58 = vsel %vm539_vm8, 16843009, %v1309_v43  ;;  %v609_v59 = vpop.f32.mrf.mxu1  ;;  %vm725_vm10 = vcmp.gt.f32.partialorder %v714_v57, 0.0 }
 0x1b3   :  { %542 = vst [vmem:[#allocation5 + $0x10] sm:$0xff] %v540_v58  ;;  %vm728_vm11 = vmpackc.low %vm726_vm7, %vm725_vm10  ;;  %v1243_v60 = vpop.f32.mrf.mxu0  ;;  %vm628_vm12 = vcmp.gt.f32.partialorder %v609_v59, 0.0 }
 0x1b4   :  { %v1216_v61 = vpop.f32.mrf.mxu1  ;;  %vm729_vm13 = vmpackc.even %vm728_vm11, %vm727_vm9  ;;  %vm914_vm2 = vcmp.gt.f32.partialorder %v1243_v60, 0.0 }
 0x1b5   :  { %v894_v62 = vpop.f32.mrf.mxu0  ;;  %v730_v0 = vsel %vm729_vm13, 16843009, %v1309_v43  ;;  %vm632_vm15 = vmpackc.low %vm629_vm14, %vm628_vm12  ;;  %vm631_vm0 = vcmp.gt.f32.partialorder %v1216_v61, 0.0 }
 0x1b6   :  { %v619_v63 = vpop.f32.mrf.mxu1  ;;  %732 = vst [vmem:[#allocation5 + $0x20] sm:$0xff] %v730_v0  ;;  %vm913_vm3 = vcmp.gt.f32.partialorder %v894_v62, 0.0 }
 0x1b7   :  { %vm630_vm1 = vcmp.gt.f32.partialorder %v619_v63, 0.0  ;;  %v1246_v1 = vpop.f32.mrf.mxu0  ;;  %vm917_vm7 = vmpackc.low %vm914_vm2, %vm913_vm3 }
 0x1b8   :  { %vm633_vm4 = vmpackc.low %vm631_vm0, %vm630_vm1  ;;  %v1233_v2 = vpop.f32.mrf.mxu1  ;;  %vm916_vm5 = vcmp.gt.f32.partialorder %v1246_v1, 0.0 }
 0x1b9   :  { %vm634_vm6 = vmpackc.even %vm633_vm4, %vm632_vm15  ;;  %v904_v3 = vpop.f32.mrf.mxu0  ;;  %vm819_vm12 = vcmp.gt.f32.partialorder %v1233_v2, 0.0 }
 0x1ba   :  { %v635_v4 = vsel %vm634_vm6, 16843009, %v1309_v43  ;;  %v799_v5 = vpop.f32.mrf.mxu1  ;;  %vm915_vm8 = vcmp.gt.f32.partialorder %v904_v3, 0.0 }
 0x1bb   :  { %637 = vst [vmem:[#allocation5 + $0x18] sm:$0xff] %v635_v4  ;;  %vm918_vm9 = vmpackc.low %vm916_vm5, %vm915_vm8  ;;  %vm818_vm10 = vcmp.gt.f32.partialorder %v799_v5, 0.0 }
 0x1bc   :  { %v1236_v6 = vpop.f32.mrf.mxu1  ;;  %vm919_vm11 = vmpackc.even %vm918_vm9, %vm917_vm7 }
 0x1bd   :  { %v920_v8 = vsel %vm919_vm11, 16843009, %v1309_v43  ;;  %vm822_vm13 = vmpackc.low %vm819_vm12, %vm818_vm10  ;;  %vm821_vm14 = vcmp.gt.f32.partialorder %v1236_v6, 0.0 }
 0x1be   :  { %v809_v7 = vpop.f32.mrf.mxu1  ;;  %922 = vst [vmem:[#allocation5 + $0x30] sm:$0xff] %v920_v8 }
 0x1bf   :  { %vm820_vm0 = vcmp.gt.f32.partialorder %v809_v7, 0.0 }
 0x1c0   :  { %vm823_vm15 = vmpackc.low %vm821_vm14, %vm820_vm0  ;;  %v1253_v9 = vpop.f32.mrf.mxu1 }
 0x1c1   :  { %vm824_vm1 = vmpackc.even %vm823_vm15, %vm822_vm13  ;;  %vm1009_vm3 = vcmp.gt.f32.partialorder %v1253_v9, 0.0 }
 0x1c2   :  { %v825_v10 = vsel %vm824_vm1, 16843009, %v1309_v43  ;;  %v989_v11 = vpop.f32.mrf.mxu1 }
 0x1c3   :  { %827 = vst [vmem:[#allocation5 + $0x28] sm:$0xff] %v825_v10  ;;  %vm1008_vm2 = vcmp.gt.f32.partialorder %v989_v11, 0.0 }
 0x1c4   :  { %v1256_v12 = vpop.f32.mrf.mxu1  ;;  %vm1012_vm4 = vmpackc.low %vm1009_vm3, %vm1008_vm2 }
 0x1c5   :  { %vm1011_vm5 = vcmp.gt.f32.partialorder %v1256_v12, 0.0 }
 0x1c6   :  { %v999_v13 = vpop.f32.mrf.mxu1 }
 0x1c7   :  { %vm1010_vm6 = vcmp.gt.f32.partialorder %v999_v13, 0.0 }
 0x1c8   :  { %vm1013_vm7 = vmpackc.low %vm1011_vm5, %vm1010_vm6 }
 0x1c9   :  { %vm1014_vm8 = vmpackc.even %vm1013_vm7, %vm1012_vm4 }
 0x1ca   :  { %v1015_v14 = vsel %vm1014_vm8, 16843009, %v1309_v43 }
 0x1cb   :  { %1017 = vst [vmem:[#allocation5 + $0x38] sm:$0xff] %v1015_v14 }
 0x1cc   :  { %1293 = shalt.err (!%p1290_p9)
}
 0x1cd   :  { %1029 = dma.vmem_to_hbm [thread:$0]  %s1024_s29, 1024, %s1460_s3, [#allocation4], %s1307_s15, %s1307_s15, %s1308_s16  }
 0x1ce   :  { %1304 = dma.done.wait [#allocation4], 1024  }
 0x1cf   :  { %1305 = vsyncadd [#allocation4], 4294966272 }
 0x1d0   :  { %1033 = vsyncpa [#allocation3], 1 }
 0x1d1   :  { %1034 = vsyncpa [#allocation4], 1 }

</bundles_post_ra>
